<compile_context>
chip_gen: v7x
topology: tpu7x:2x2x1
jax: 0.10.0
libtpu: 0.0.40
codegen_flags: <defaults>
</compile_context>

<pallas_src>
import jax
import jax.numpy as jnp
from jax.experimental import pallas as pl
from jax.experimental.pallas import tpu as pltpu

F_IN, HID, F_OUT = 4, 16, 4
LANES = 128
GROUPS = HID // F_OUT                 # 4 hidden groups of 4 -> 4*128 = 512 hidden lanes
ROWS_PER_LANE_ROW = LANES // F_IN     # 32 batch rows per 128-lane row (features interleaved)
assert F_IN == F_OUT, "input/output interleave factor must match"

TARGET_TILES = 4        # aim for >=4 grid steps (keeps both v7x TCs busy) when B is large enough
MAX_TILE_ROWS = 1024    # 1024 lane-rows = 32768 batch rows -> 512 KiB/operand/step (f32)


def _round_up(a, m):
    return -(-a // m) * m


def mlp_kernel(w1_ref, w2_ref, b1_ref, b2_ref, x_ref, o_ref):
    """Fused Linear(4,16) -> ReLU -> Linear(16,4) on interleaved [R, 128] tiles.

    w1_ref : VMEM [128, 512]  block-diagonal interleave-aware layer-1 weights (resident)
    w2_ref : VMEM [512, 128]  block-diagonal interleave-aware layer-2 weights (resident)
    b1_ref : VMEM [1, 512]    f32 lane pattern of b1 (resident)
    b2_ref : VMEM [1, 128]    f32 lane pattern of b2 (resident)
    x_ref  : VMEM [tile_R, 128]  interleaved input tile  (lane 4m+k == row m, feature k)
    o_ref  : VMEM [tile_R, 128]  interleaved output tile (same layout, caller dtype)
    """
    x = x_ref[...]
    # Layer 1 on the MXU: 128-deep contraction, 4 useful terms per output lane.
    h = jnp.dot(x, w1_ref[...], preferred_element_type=jnp.float32)        # [R, 512] f32
    # Bias + ReLU on the VPU (f32 accumulate), cast back to the compute dtype.
    h = jnp.maximum(h + b1_ref[...], 0.0).astype(x_ref.dtype)
    # Layer 2 on the MXU: 512-deep contraction (16 useful terms per output lane).
    y = jnp.dot(h, w2_ref[...], preferred_element_type=jnp.float32)        # [R, 128] f32
    # Final bias + cast to the caller's dtype; full-lane (128) unmasked stores.
    o_ref[...] = (y + b2_ref[...]).astype(o_ref.dtype)


@jax.jit
def nn_wrapper_forward(x, w1, b1, w2, b2):
    """Pallas equivalent of NNWrapper.forward. x: [..., 4] -> [..., 4]."""
    lead = x.shape[:-1]
    x2 = x.reshape(-1, F_IN)
    B = x2.shape[0]

    # Compute/output dtype follows the caller (bf16 native on v6e/v7x; f32 otherwise).
    cdt = jnp.bfloat16 if x.dtype == jnp.bfloat16 else jnp.float32
    sub = 16 if cdt == jnp.bfloat16 else 8          # sublane granularity for packed dtypes

    # --- static batch tiling (snug tiles, >= TARGET_TILES steps when possible) ---
    r_needed = pl.cdiv(B, ROWS_PER_LANE_ROW)                          # lane-rows covering B
    tile_r = min(MAX_TILE_ROWS,
                 max(sub, _round_up(pl.cdiv(r_needed, TARGET_TILES), sub)))
    r_total = _round_up(r_needed, tile_r)
    n_tiles = r_total // tile_r
    bp = r_total * ROWS_PER_LANE_ROW

    # --- layout: natural interleaved lane-dense view, NO transpose ---------------
    # (pad + convert + reshape fuse into a single cheap XLA pass; kernel reads
    #  exactly 16 B/row and writes exactly 16 B/row.)
    x_i = jnp.pad(x2.astype(cdt), ((0, bp - B), (0, 0))).reshape(r_total, LANES)

    # --- block-diagonal interleave-aware weights (tiny, resident in VMEM) --------
    w1f = w1.astype(jnp.float32)
    w2f = w2.astype(jnp.float32)
    eye = jnp.eye(ROWS_PER_LANE_ROW, dtype=jnp.float32)
    w1_big = jnp.concatenate(
        [jnp.kron(eye, w1f[:, 4 * g:4 * g + 4]) for g in range(GROUPS)], axis=1
    ).astype(cdt)                                                      # [128, 512]
    w2_big = jnp.concatenate(
        [jnp.kron(eye, w2f[4 * g:4 * g + 4, :]) for g in range(GROUPS)], axis=0
    ).astype(cdt)                                                      # [512, 128]
    b1_lanes = jnp.tile(
        b1.astype(jnp.float32).reshape(GROUPS, 1, 4), (1, ROWS_PER_LANE_ROW, 1)
    ).reshape(1, GROUPS * LANES)                                       # [1, 512] f32
    b2_lanes = jnp.tile(b2.astype(jnp.float32), ROWS_PER_LANE_ROW).reshape(1, LANES)

    y_i = pl.pallas_call(
        mlp_kernel,
        out_shape=jax.ShapeDtypeStruct((r_total, LANES), cdt),
        grid=(n_tiles,),
        in_specs=[
            # Weights / biases: constant block index -> fetched once, resident.
            pl.BlockSpec((LANES, GROUPS * LANES), lambda i: (0, 0)),
            pl.BlockSpec((GROUPS * LANES, LANES), lambda i: (0, 0)),
            pl.BlockSpec((1, GROUPS * LANES), lambda i: (0, 0)),
            pl.BlockSpec((1, LANES), lambda i: (0, 0)),
            # Activations: one large batch tile per grid step, double-buffered.
            pl.BlockSpec((tile_r, LANES), lambda i: (i, 0)),
        ],
        out_specs=pl.BlockSpec((tile_r, LANES), lambda i: (i, 0)),
        compiler_params=pltpu.CompilerParams(
            dimension_semantics=("parallel",),   # v7x: shard batch tiles over its 2 TCs
        ),
    )(w1_big, w2_big, b1_lanes, b2_lanes, x_i)

    y = y_i.reshape(bp, F_OUT)[:B].reshape(*lead, F_OUT)
    return y if y.dtype == x.dtype else y.astype(x.dtype)


def init_params(key):
    """Deterministic init mimicking PyTorch nn.Linear default U[-1/sqrt(fan_in), ...]."""
    k1, k2, k3, k4 = jax.random.split(key, 4)
    bound1 = 1.0 / jnp.sqrt(F_IN)
    bound2 = 1.0 / jnp.sqrt(HID)
    w1 = jax.random.uniform(k1, (F_IN, HID), jnp.float32, -bound1, bound1)
    b1 = jax.random.uniform(k2, (HID,), jnp.float32, -bound1, bound1)
    w2 = jax.random.uniform(k3, (HID, F_OUT), jnp.float32, -bound2, bound2)
    b2 = jax.random.uniform(k4, (F_OUT,), jnp.float32, -bound2, bound2)
    return w1, b1, w2, b2


if __name__ == "__main__":
    key = jax.random.PRNGKey(0)
    k_params, k_x1, k_x2, k_x3 = jax.random.split(key, 4)
    w1, b1, w2, b2 = init_params(k_params)

    def ref_fwd(x, w1_=w1, w2_=w2):
        return jnp.maximum(x @ w1_ + b1, 0.0) @ w2_ + b2

    # Small case consistent with the module's tiny feature sizes.
    x_small = jax.random.normal(k_x1, (8, F_IN), jnp.float32)
    out_small = jax.block_until_ready(nn_wrapper_forward(x_small, w1, b1, w2, b2))
    assert out_small.shape == (8, F_OUT) and out_small.dtype == jnp.float32
    assert jnp.allclose(out_small, ref_fwd(x_small), atol=1e-4, rtol=1e-4)

    # Medium case: exercises padding slice-off + a multi-tile "parallel" batch grid.
    x_med = jax.random.normal(k_x2, (9000, F_IN), jnp.float32)
    out_med = jax.block_until_ready(nn_wrapper_forward(x_med, w1, b1, w2, b2))
    assert out_med.shape == (9000, F_OUT)
    assert jnp.allclose(out_med, ref_fwd(x_med), atol=1e-4, rtol=1e-4)

    # bf16 path (native on v6e/v7x, upcast internally on v5e). Compared against a
    # bf16-quantized-weight reference with loosened tolerances (bf16 math).
    x_bf = jax.random.normal(k_x3, (1000, F_IN), jnp.float32).astype(jnp.bfloat16)
    out_bf = jax.block_until_ready(nn_wrapper_forward(x_bf, w1, b1, w2, b2))
    assert out_bf.shape == (1000, F_OUT) and out_bf.dtype == jnp.bfloat16
    w1q = w1.astype(jnp.bfloat16).astype(jnp.float32)
    w2q = w2.astype(jnp.bfloat16).astype(jnp.float32)
    ref_bf = ref_fwd(x_bf.astype(jnp.float32), w1q, w2q)
    assert jnp.allclose(out_bf.astype(jnp.float32), ref_bf, atol=5e-2, rtol=5e-2)

    # TODO(synk): model.pth checkpoint loading / logging from the PyTorch module is
    # host-side I/O with no Pallas equivalent; params are initialized in-script.
    print("KERNEL_OK")
</pallas_src>

<mosaic_0001>
module attributes {stable_mosaic.version = 11 : i64} {
  func.func @mlp_kernel(%arg0: i32, %arg1: memref<128x512xf32, #tpu.memory_space<vmem>>, %arg2: memref<512x128xf32, #tpu.memory_space<vmem>>, %arg3: memref<1x512xf32, #tpu.memory_space<vmem>>, %arg4: memref<1x128xf32, #tpu.memory_space<vmem>>, %arg5: memref<8x128xf32, #tpu.memory_space<vmem>>, %arg6: memref<8x128xf32, #tpu.memory_space<vmem>>) attributes {dimension_semantics = [#tpu.dimension_semantics<parallel>], iteration_bounds = array<i64: 1>, scalar_prefetch = 0 : i64, scratch_operands = 0 : i64, tpu.core_type = #tpu.core_type<tc>, window_params = [{pipeline_mode = #tpu.pipeline_mode<synchronous>, transform_indices = @transform_0, window_bounds = array<i64: 128, 512>}, {pipeline_mode = #tpu.pipeline_mode<synchronous>, transform_indices = @transform_1, window_bounds = array<i64: 512, 128>}, {pipeline_mode = #tpu.pipeline_mode<synchronous>, transform_indices = @transform_2, window_bounds = array<i64: 1, 512>}, {pipeline_mode = #tpu.pipeline_mode<synchronous>, transform_indices = @transform_3, window_bounds = array<i64: 1, 128>}, {transform_indices = @transform_4, window_bounds = array<i64: 8, 128>}, {transform_indices = @transform_5, window_bounds = array<i64: 8, 128>}]} {
    %c0 = arith.constant 0 : index
    %c0_0 = arith.constant 0 : index
    %0 = vector.load %arg5[%c0, %c0_0] : memref<8x128xf32, #tpu.memory_space<vmem>>, vector<8x128xf32>
    %c0_1 = arith.constant 0 : index
    %c0_2 = arith.constant 0 : index
    %1 = vector.load %arg1[%c0_1, %c0_2] : memref<128x512xf32, #tpu.memory_space<vmem>>, vector<128x512xf32>
    %cst = arith.constant dense<0.000000e+00> : vector<8x512xf32>
    %2 = tpu.matmul %0, %1, %cst {dimension_numbers = #tpu.dot_dimension_numbers<[1], [0], [0], [1], [0, 0, 1, 1], [], []>} : vector<8x128xf32>, vector<128x512xf32>, vector<8x512xf32> -> vector<8x512xf32>
    %c0_3 = arith.constant 0 : index
    %c0_4 = arith.constant 0 : index
    %3 = vector.load %arg3[%c0_3, %c0_4] : memref<1x512xf32, #tpu.memory_space<vmem>>, vector<1x512xf32>
    %4 = vector.broadcast %3 : vector<1x512xf32> to vector<8x512xf32>
    %5 = arith.addf %2, %4 : vector<8x512xf32>
    %cst_5 = arith.constant 0.000000e+00 : f32
    %6 = vector.broadcast %cst_5 : f32 to vector<8x512xf32>
    %7 = arith.maximumf %5, %6 : vector<8x512xf32>
    %c0_6 = arith.constant 0 : index
    %c0_7 = arith.constant 0 : index
    %8 = vector.load %arg2[%c0_6, %c0_7] : memref<512x128xf32, #tpu.memory_space<vmem>>, vector<512x128xf32>
    %cst_8 = arith.constant dense<0.000000e+00> : vector<8x128xf32>
    %9 = tpu.matmul %7, %8, %cst_8 {dimension_numbers = #tpu.dot_dimension_numbers<[1], [0], [0], [1], [0, 0, 1, 1], [], []>} : vector<8x512xf32>, vector<512x128xf32>, vector<8x128xf32> -> vector<8x128xf32>
    %c0_9 = arith.constant 0 : index
    %c0_10 = arith.constant 0 : index
    %10 = vector.load %arg4[%c0_9, %c0_10] : memref<1x128xf32, #tpu.memory_space<vmem>>, vector<1x128xf32>
    %11 = vector.broadcast %10 : vector<1x128xf32> to vector<8x128xf32>
    %12 = arith.addf %9, %11 : vector<8x128xf32>
    %c0_11 = arith.constant 0 : index
    %c0_12 = arith.constant 0 : index
    %13 = vector.load %arg6[%c0_11, %c0_12] : memref<8x128xf32, #tpu.memory_space<vmem>>, vector<8x128xf32>
    tpu.vector_store %arg6[%c0_11, %c0_12], %12 {strides = array<i32>} : memref<8x128xf32, #tpu.memory_space<vmem>>, vector<8x128xf32>,
    return
  }
  func.func @transform_0(%arg0: i32) -> (i32, i32) {
    %c0_i32 = arith.constant 0 : i32
    %c0_i32_0 = arith.constant 0 : i32
    %c0_i32_1 = arith.constant 0 : i32
    return %c0_i32, %c0_i32_0 : i32, i32
  }
  func.func @transform_1(%arg0: i32) -> (i32, i32) {
    %c0_i32 = arith.constant 0 : i32
    %c0_i32_0 = arith.constant 0 : i32
    %c0_i32_1 = arith.constant 0 : i32
    return %c0_i32, %c0_i32_0 : i32, i32
  }
  func.func @transform_2(%arg0: i32) -> (i32, i32) {
    %c0_i32 = arith.constant 0 : i32
    %c0_i32_0 = arith.constant 0 : i32
    %c0_i32_1 = arith.constant 0 : i32
    return %c0_i32, %c0_i32_0 : i32, i32
  }
  func.func @transform_3(%arg0: i32) -> (i32, i32) {
    %c0_i32 = arith.constant 0 : i32
    %c0_i32_0 = arith.constant 0 : i32
    %c0_i32_1 = arith.constant 0 : i32
    return %c0_i32, %c0_i32_0 : i32, i32
  }
  func.func @transform_4(%arg0: i32) -> (i32, i32) {
    %c0_i32 = arith.constant 0 : i32
    %c0_i32_0 = arith.constant 0 : i32
    return %arg0, %c0_i32 : i32, i32
  }
  func.func @transform_5(%arg0: i32) -> (i32, i32) {
    %c0_i32 = arith.constant 0 : i32
    %c0_i32_0 = arith.constant 0 : i32
    return %arg0, %c0_i32 : i32, i32
  }
}

</mosaic_0001>

<bundles_post_ra>
// kernel: tile.16
= control target key start
LH: loop header
LB: loop body
LE: loop exit
PB: predicated region body
PF: predicated region fallthrough
CT: control target
= control target key end

     0   :  { %s40_s0 = inlined_call_operand.vmem [shape: f32[4], index: 0, kind: input, shape index: {}]   ;;  %s41_s1 = inlined_call_operand.vmem [shape: f32[32,4], index: 1, kind: output, shape index: {}]  }
   0x1   :  { %v4_v0 = vld [vmem:[%s40_s0] ss:$0 sm:$0xff] }
   0x2   :  { %5 = vst [vmem:[%s41_s1] sm:$0xff] %v4_v0  ;;  %12 = vst [vmem:[%s41_s1 + $0x8] sm:$0xff] %v4_v0 }
   0x3   :  { %13 = vst [vmem:[%s41_s1 + $0x10] sm:$0xff] %v4_v0  ;;  %14 = vst [vmem:[%s41_s1 + $0x18] sm:$0xff] %v4_v0 }

// kernel: tile.17
= control target key start
LH: loop header
LB: loop body
LE: loop exit
PB: predicated region body
PF: predicated region fallthrough
CT: control target
= control target key end

     0   :  { %s259_s10 = smov 124   ;;  %s260_s11 = smov 116   ;;  %vm3_vm0 = vcmask 31744   ;;  %vm9_vm1 = vcmask 1048544   ;;  %vm15_vm2 = vcmask 1015744   ;;  %vm21_vm3 = vcmask 982944   ;;  %s399_s0 = inlined_call_operand.vmem [shape: f32[32,4], index: 0, kind: input, shape index: {}]   ;;  %s400_s1 = inlined_call_operand.vmem [shape: f32[1,128], index: 1, kind: output, shape index: {}]  }
   0x1   :  { %v197_v0 = vld [vmem:[%s399_s0 + $0x1f] sm:$0x1]   ;;  %v199_v1 = vld [vmem:[%s399_s0 + $0x1d] sm:$0x1]   ;;  %v198_v2 = vld [vmem:[%s399_s0 + $0x1e] sm:$0x1]  }
   0x2   :  { %7 = vrot.lane.b32.xlu0 %v197_v0, %s259_s10  ;;  %19 = vrot.lane.b32.xlu1 %v199_v1, %s260_s11  ;;  %v200_v3 = vld [vmem:[%s399_s0 + $0x1c] sm:$0x1]   ;;  %s261_s16 = smov 120   ;;  %s262_s17 = smov 112   ;;  %v201_v4 = vld [vmem:[%s399_s0 + $0x1b] sm:$0x1]  }
   0x3   :  { %v202_v5 = vld [vmem:[%s399_s0 + $0x1a] sm:$0x1]   ;;  %s263_s22 = smov 108   ;;  %s264_s23 = smov 104   ;;  %v203_v6 = vld [vmem:[%s399_s0 + $0x19] sm:$0x1]  }
   0x4   :  { %v204_v7 = vld [vmem:[%s399_s0 + $0x18] sm:$0x1]   ;;  %s265_s28 = smov 100   ;;  %s266_s29 = smov 96   ;;  %v205_v8 = vld [vmem:[%s399_s0 + $0x17] sm:$0x1]  }
   0x5   :  { %v206_v9 = vld [vmem:[%s399_s0 + $0x16] sm:$0x1]   ;;  %v2_v10 = vld [vmem:[%s399_s0] sm:$0x1]   ;;  %s267_s7 = smov 92   ;;  %s268_s8 = smov 88  }
   0x6   :  { %13 = vrot.lane.b32.xlu0 %v198_v2, %s261_s16  ;;  %25 = vrot.lane.b32.xlu1 %v200_v3, %s262_s17  ;;  %4 = vst.msk [vmem:[#allocation0] sm:$0x1] %vm3_vm0, %v2_v10   ;;  %v207_v11 = vld [vmem:[%s399_s0 + $0x15] sm:$0x1]   ;;  %v208_v12 = vld [vmem:[%s399_s0 + $0x14] sm:$0x1]  }
   0x7   :  { %s269_s13 = smov 84   ;;  %s270_s14 = smov 80   ;;  %v209_v13 = vld [vmem:[%s399_s0 + $0x13] sm:$0x1]   ;;  %v210_v14 = vld [vmem:[%s399_s0 + $0x12] sm:$0x1]  }
   0x8   :  { %s271_s19 = smov 76   ;;  %s272_s20 = smov 72   ;;  %v211_v15 = vld [vmem:[%s399_s0 + $0x11] sm:$0x1]   ;;  %v212_v16 = vld [vmem:[%s399_s0 + $0x10] sm:$0x1]  }
   0x9   :  { %s273_s25 = smov 68   ;;  %s274_s26 = smov 64   ;;  %v213_v17 = vld [vmem:[%s399_s0 + $0xf] sm:$0x1]   ;;  %v214_v18 = vld [vmem:[%s399_s0 + $0xe] sm:$0x1]  }
   0xa   :  { %31 = vrot.lane.b32.xlu0 %v201_v4, %s263_s22  ;;  %37 = vrot.lane.b32.xlu1 %v202_v5, %s264_s23  ;;  %s275_s2 = smov 60   ;;  %s276_s3 = smov 56   ;;  %v215_v19 = vld [vmem:[%s399_s0 + $0xd] sm:$0x1]   ;;  %v216_v20 = vld [vmem:[%s399_s0 + $0xc] sm:$0x1]  }
   0xb   :  { %s278_s9 = smov 48   ;;  %v217_v21 = vld [vmem:[%s399_s0 + $0xb] sm:$0x1]   ;;  %v218_v22 = vld [vmem:[%s399_s0 + $0xa] sm:$0x1]   ;;  %s280_s15 = smov 40  }
   0xc   :  { %v219_v23 = vld [vmem:[%s399_s0 + $0x9] sm:$0x1]   ;;  %v220_v24 = vld [vmem:[%s399_s0 + $0x8] sm:$0x1]   ;;  %s282_s21 = smov 32   ;;  %s284_s27 = smov 24  }
   0xd   :  { %v221_v25 = vld [vmem:[%s399_s0 + $0x7] sm:$0x1]   ;;  %v222_v26 = vld [vmem:[%s399_s0 + $0x6] sm:$0x1]   ;;  %v223_v27 = vld [vmem:[%s399_s0 + $0x5] sm:$0x1]  }
   0xe   :  { %43 = vrot.lane.b32.xlu0 %v203_v6, %s265_s28  ;;  %49 = vrot.lane.b32.xlu1 %v204_v7, %s266_s29  ;;  %v224_v28 = vld [vmem:[%s399_s0 + $0x4] sm:$0x1]   ;;  %s286_s4 = smov 16   ;;  %v225_v29 = vld [vmem:[%s399_s0 + $0x3] sm:$0x1]   ;;  %s288_s10 = smov 8  }
   0xf   :  { %v226_v30 = vld [vmem:[%s399_s0 + $0x2] sm:$0x1]   ;;  %v227_v31 = vld [vmem:[%s399_s0 + $0x1] sm:$0x1]   ;;  %s289_s0 = smov 4   ;;  %vm27_vm4 = vcmask 950144  }
  0x10   :  { %vm33_vm5 = vcmask 917344   ;;  %vm39_vm6 = vcmask 884544   ;;  %vm45_vm7 = vcmask 851744   ;;  %vm51_vm8 = vcmask 818944  }
  0x11   :  { %vm57_vm9 = vcmask 786144   ;;  %vm63_vm10 = vcmask 753344   ;;  %vm69_vm11 = vcmask 720544   ;;  %vm75_vm12 = vcmask 687744  }
  0x12   :  { %55 = vrot.lane.b32.xlu0 %v205_v8, %s267_s7  ;;  %61 = vrot.lane.b32.xlu1 %v206_v9, %s268_s8  ;;  %s277_s8 = smov 52   ;;  %vm81_vm13 = vcmask 654944   ;;  %vm87_vm14 = vcmask 622144   ;;  %vm93_vm15 = vcmask 589344   ;;  %vm99_vm0 = vcmask 556544  }
  0x16   :  { %67 = vrot.lane.b32.xlu0 %v207_v11, %s269_s13  ;;  %73 = vrot.lane.b32.xlu1 %v208_v12, %s270_s14  ;;  %s279_s14 = smov 44  }
  0x1a   :  { %79 = vrot.lane.b32.xlu0 %v209_v13, %s271_s19  ;;  %85 = vrot.lane.b32.xlu1 %v210_v14, %s272_s20  ;;  %s281_s20 = smov 36  }
  0x1e   :  { %91 = vrot.lane.b32.xlu0 %v211_v15, %s273_s25  ;;  %97 = vrot.lane.b32.xlu1 %v212_v16, %s274_s26  ;;  %s283_s26 = smov 28  }
  0x22   :  { %103 = vrot.lane.b32.xlu0 %v213_v17, %s275_s2  ;;  %109 = vrot.lane.b32.xlu1 %v214_v18, %s276_s3  ;;  %s285_s3 = smov 20  }
  0x26   :  { %115 = vrot.lane.b32.xlu0 %v215_v19, %s277_s8  ;;  %121 = vrot.lane.b32.xlu1 %v216_v20, %s278_s9  ;;  %s287_s9 = smov 12  }
  0x2a   :  { %127 = vrot.lane.b32.xlu0 %v217_v21, %s279_s14  ;;  %133 = vrot.lane.b32.xlu1 %v218_v22, %s280_s15 }
  0x2e   :  { %139 = vrot.lane.b32.xlu0 %v219_v23, %s281_s20  ;;  %145 = vrot.lane.b32.xlu1 %v220_v24, %s282_s21 }
  0x32   :  { %151 = vrot.lane.b32.xlu0 %v221_v25, %s283_s26  ;;  %157 = vrot.lane.b32.xlu1 %v222_v26, %s284_s27 }
  0x36   :  { %163 = vrot.lane.b32.xlu0 %v223_v27, %s285_s3  ;;  %169 = vrot.lane.b32.xlu1 %v224_v28, %s286_s4 }
  0x3a   :  { %175 = vrot.lane.b32.xlu0 %v225_v29, %s287_s9  ;;  %181 = vrot.lane.b32.xlu1 %v226_v30, %s288_s10 }
  0x3e   :  { %187 = vrot.lane.b32.xlu0 %v227_v31, %s289_s0 }
  0x74   :  { %v8_v32 = vpop.permute.xlu0 %7   ;;  %v20_v33 = vpop.permute.xlu1 %19  }
  0x75   :  { %10 = vst.msk [vmem:[#allocation0] sm:$0x1] %vm9_vm1, %v8_v32   ;;  %vm105_vm1 = vcmask 523744  }
  0x78   :  { %v14_v34 = vpop.permute.xlu0 %13   ;;  %v26_v35 = vpop.permute.xlu1 %25  }
  0x79   :  { %16 = vst.msk [vmem:[#allocation0] sm:$0x1] %vm15_vm2, %v14_v34   ;;  %vm111_vm2 = vcmask 490944  }
  0x7a   :  { %22 = vst.msk [vmem:[#allocation0] sm:$0x1] %vm21_vm3, %v20_v33   ;;  %vm117_vm3 = vcmask 458144  }
  0x7b   :  { %28 = vst.msk [vmem:[#allocation0] sm:$0x1] %vm27_vm4, %v26_v35   ;;  %vm123_vm4 = vcmask 425344  }
  0x7c   :  { %v32_v36 = vpop.permute.xlu0 %31   ;;  %v38_v37 = vpop.permute.xlu1 %37  }
  0x7d   :  { %34 = vst.msk [vmem:[#allocation0] sm:$0x1] %vm33_vm5, %v32_v36   ;;  %vm129_vm5 = vcmask 392544  }
  0x7e   :  { %40 = vst.msk [vmem:[#allocation0] sm:$0x1] %vm39_vm6, %v38_v37   ;;  %vm135_vm6 = vcmask 359744  }
  0x80   :  { %v44_v38 = vpop.permute.xlu0 %43   ;;  %v50_v39 = vpop.permute.xlu1 %49  }
  0x81   :  { %46 = vst.msk [vmem:[#allocation0] sm:$0x1] %vm45_vm7, %v44_v38   ;;  %vm141_vm7 = vcmask 326944  }
  0x82   :  { %52 = vst.msk [vmem:[#allocation0] sm:$0x1] %vm51_vm8, %v50_v39   ;;  %vm147_vm8 = vcmask 294144  }
  0x84   :  { %v56_v40 = vpop.permute.xlu0 %55   ;;  %v62_v41 = vpop.permute.xlu1 %61  }
  0x85   :  { %58 = vst.msk [vmem:[#allocation0] sm:$0x1] %vm57_vm9, %v56_v40   ;;  %vm153_vm9 = vcmask 261344  }
  0x86   :  { %64 = vst.msk [vmem:[#allocation0] sm:$0x1] %vm63_vm10, %v62_v41   ;;  %vm159_vm10 = vcmask 228544  }
  0x88   :  { %v68_v42 = vpop.permute.xlu0 %67   ;;  %v74_v43 = vpop.permute.xlu1 %73  }
  0x89   :  { %70 = vst.msk [vmem:[#allocation0] sm:$0x1] %vm69_vm11, %v68_v42   ;;  %vm165_vm11 = vcmask 195744  }
  0x8a   :  { %76 = vst.msk [vmem:[#allocation0] sm:$0x1] %vm75_vm12, %v74_v43   ;;  %vm171_vm12 = vcmask 162944  }
  0x8c   :  { %v80_v44 = vpop.permute.xlu0 %79   ;;  %v86_v45 = vpop.permute.xlu1 %85  }
  0x8d   :  { %82 = vst.msk [vmem:[#allocation0] sm:$0x1] %vm81_vm13, %v80_v44   ;;  %vm177_vm13 = vcmask 130144  }
  0x8e   :  { %88 = vst.msk [vmem:[#allocation0] sm:$0x1] %vm87_vm14, %v86_v45   ;;  %vm183_vm14 = vcmask 97344  }
  0x90   :  { %v92_v46 = vpop.permute.xlu0 %91   ;;  %v98_v47 = vpop.permute.xlu1 %97  }
  0x91   :  { %94 = vst.msk [vmem:[#allocation0] sm:$0x1] %vm93_vm15, %v92_v46   ;;  %vm189_vm15 = vcmask 64544  }
  0x92   :  { %100 = vst.msk [vmem:[#allocation0] sm:$0x1] %vm99_vm0, %v98_v47  }
  0x94   :  { %v104_v48 = vpop.permute.xlu0 %103   ;;  %v110_v49 = vpop.permute.xlu1 %109  }
  0x95   :  { %106 = vst.msk [vmem:[#allocation0] sm:$0x1] %vm105_vm1, %v104_v48  }
  0x96   :  { %112 = vst.msk [vmem:[#allocation0] sm:$0x1] %vm111_vm2, %v110_v49  }
  0x98   :  { %v116_v50 = vpop.permute.xlu0 %115   ;;  %v122_v51 = vpop.permute.xlu1 %121  }
  0x99   :  { %118 = vst.msk [vmem:[#allocation0] sm:$0x1] %vm117_vm3, %v116_v50  }
  0x9a   :  { %124 = vst.msk [vmem:[#allocation0] sm:$0x1] %vm123_vm4, %v122_v51  }
  0x9c   :  { %v128_v52 = vpop.permute.xlu0 %127   ;;  %v134_v53 = vpop.permute.xlu1 %133  }
  0x9d   :  { %130 = vst.msk [vmem:[#allocation0] sm:$0x1] %vm129_vm5, %v128_v52  }
  0x9e   :  { %136 = vst.msk [vmem:[#allocation0] sm:$0x1] %vm135_vm6, %v134_v53  }
  0xa0   :  { %v140_v54 = vpop.permute.xlu0 %139   ;;  %v146_v55 = vpop.permute.xlu1 %145  }
  0xa1   :  { %142 = vst.msk [vmem:[#allocation0] sm:$0x1] %vm141_vm7, %v140_v54  }
  0xa2   :  { %148 = vst.msk [vmem:[#allocation0] sm:$0x1] %vm147_vm8, %v146_v55  }
  0xa4   :  { %v152_v56 = vpop.permute.xlu0 %151   ;;  %v158_v57 = vpop.permute.xlu1 %157  }
  0xa5   :  { %154 = vst.msk [vmem:[#allocation0] sm:$0x1] %vm153_vm9, %v152_v56  }
  0xa6   :  { %160 = vst.msk [vmem:[#allocation0] sm:$0x1] %vm159_vm10, %v158_v57  }
  0xa8   :  { %v164_v58 = vpop.permute.xlu0 %163   ;;  %v170_v59 = vpop.permute.xlu1 %169  }
  0xa9   :  { %166 = vst.msk [vmem:[#allocation0] sm:$0x1] %vm165_vm11, %v164_v58  }
  0xaa   :  { %172 = vst.msk [vmem:[#allocation0] sm:$0x1] %vm171_vm12, %v170_v59  }
  0xac   :  { %v176_v60 = vpop.permute.xlu0 %175   ;;  %v182_v61 = vpop.permute.xlu1 %181  }
  0xad   :  { %178 = vst.msk [vmem:[#allocation0] sm:$0x1] %vm177_vm13, %v176_v60  }
  0xae   :  { %184 = vst.msk [vmem:[#allocation0] sm:$0x1] %vm183_vm14, %v182_v61  }
  0xb0   :  { %v188_v62 = vpop.permute.xlu0 %187  }
  0xb1   :  { %190 = vst.msk [vmem:[#allocation0] sm:$0x1] %vm189_vm15, %v188_v62  }
  0xb8   :  { %v194_v63 = vld [vmem:[#allocation0] sm:$0x1] }
  0xb9   :  { %196 = vst [vmem:[%s400_s1] sm:$0x1] %v194_v63 }

// kernel: nn_wrapper_forward.1
= control target key start
LH: loop header
LB: loop body
LE: loop exit
PB: predicated region body
PF: predicated region fallthrough
CT: control target
= control target key end

     0   :  { %v669_v3 = vmov 0.0   ;;  %s1096_s0 = inlined_call_operand.vmem [shape: f32[128,512], index: 0, kind: input, shape index: {}]   ;;  %s1097_s1 = inlined_call_operand.vmem [shape: f32[512,128], index: 1, kind: input, shape index: {}]   ;;  %s1098_s4 = inlined_call_operand.vmem [shape: f32[8,128], index: 4, kind: input, shape index: {}]   ;;  %s1099_s2 = inlined_call_operand.vmem [shape: f32[1,512], index: 2, kind: input, shape index: {}]   ;;  %s1100_s3 = inlined_call_operand.vmem [shape: f32[1,128], index: 3, kind: input, shape index: {}]   ;;  %s1101_s5 = inlined_call_operand.vmem [shape: f32[8,128], index: 5, kind: output, shape index: {}]  }
   0x1   :  { %v22_v0 = vld [vmem:[%s1096_s0 + $0x8] sm:$0xff]  ;;  %v24_v2 = vld [vmem:[%s1096_s0 + $0x18] sm:$0xff]  ;;  %171 = vmatprep.mubr.f32.mxu0 %v669_v3  ;;  %242 = vmatprep.mubr.f32.mxu1 %v669_v3  ;;  %v21_v6 = vld [vmem:[%s1096_s0] sm:$0xff] }
   0x2   :  { %v26_v1 = vld [vmem:[%s1096_s0 + $0x28] sm:$0xff]  ;;  %v28_v5 = vld [vmem:[%s1096_s0 + $0x38] sm:$0xff]  ;;  %v25_v7 = vld [vmem:[%s1096_s0 + $0x20] sm:$0xff] }
   0x3   :  { %v540_v4 = vpack.c.bf16 %v26_v1, %v22_v0  ;;  %v572_v8 = vpack.c.bf16 %v28_v5, %v24_v2  ;;  %v542_v9 = vpack.c.bf16 %v25_v7, %v21_v6  ;;  %v23_v10 = vld [vmem:[%s1096_s0 + $0x10] sm:$0xff]  ;;  %v30_v12 = vld [vmem:[%s1096_s0 + $0x48] sm:$0xff]  ;;  %v32_v15 = vld [vmem:[%s1096_s0 + $0x58] sm:$0xff] }
   0x4   :  { %v27_v11 = vld [vmem:[%s1096_s0 + $0x30] sm:$0xff]  ;;  %v34_v14 = vld [vmem:[%s1096_s0 + $0x68] sm:$0xff]  ;;  %v36_v16 = vld [vmem:[%s1096_s0 + $0x78] sm:$0xff] }
   0x5   :  { %541 = vmatprep.subr.bf16.mxu0 %v540_v4  ;;  %v574_v13 = vpack.c.bf16 %v27_v11, %v23_v10  ;;  %573 = vmatprep.subr.bf16.mxu1 %v572_v8  ;;  %v544_v17 = vpack.c.bf16 %v34_v14, %v30_v12  ;;  %v576_v18 = vpack.c.bf16 %v36_v16, %v32_v15  ;;  %v29_v19 = vld [vmem:[%s1096_s0 + $0x40] sm:$0xff]  ;;  %v31_v21 = vld [vmem:[%s1096_s0 + $0x50] sm:$0xff]  ;;  %v38_v24 = vld [vmem:[%s1096_s0 + $0x88] sm:$0xff] }
   0x6   :  { %543 = vmatpush1.bf16.msra.mxu0 %v542_v9  ;;  %v33_v20 = vld [vmem:[%s1096_s0 + $0x60] sm:$0xff]  ;;  %v35_v23 = vld [vmem:[%s1096_s0 + $0x70] sm:$0xff]  ;;  %v42_v25 = vld [vmem:[%s1096_s0 + $0xa8] sm:$0xff] }
   0x7   :  { %575 = vmatpush1.bf16.msra.mxu1 %v574_v13  ;;  %v546_v22 = vpack.c.bf16 %v33_v20, %v29_v19  ;;  %545 = vmatprep.subr.bf16.mxu0 %v544_v17  ;;  %v578_v26 = vpack.c.bf16 %v35_v23, %v31_v21  ;;  %v548_v27 = vpack.c.bf16 %v42_v25, %v38_v24  ;;  %v40_v28 = vld [vmem:[%s1096_s0 + $0x98] sm:$0xff]  ;;  %v37_v30 = vld [vmem:[%s1096_s0 + $0x80] sm:$0xff]  ;;  %v39_v33 = vld [vmem:[%s1096_s0 + $0x90] sm:$0xff] }
   0x8   :  { %577 = vmatprep.subr.bf16.mxu1 %v576_v18  ;;  %v44_v29 = vld [vmem:[%s1096_s0 + $0xb8] sm:$0xff]  ;;  %v41_v32 = vld [vmem:[%s1096_s0 + $0xa0] sm:$0xff]  ;;  %v43_v34 = vld [vmem:[%s1096_s0 + $0xb0] sm:$0xff] }
   0x9   :  { %v580_v31 = vpack.c.bf16 %v44_v29, %v40_v28  ;;  %v550_v35 = vpack.c.bf16 %v41_v32, %v37_v30  ;;  %v46_v36 = vld [vmem:[%s1096_s0 + $0xc8] sm:$0xff]  ;;  %v48_v38 = vld [vmem:[%s1096_s0 + $0xd8] sm:$0xff]  ;;  %v582_v39 = vpack.c.bf16 %v43_v34, %v39_v33  ;;  %v45_v42 = vld [vmem:[%s1096_s0 + $0xc0] sm:$0xff] }
   0xa   :  { %547 = vmatpush1.bf16.msra.mxu0 %v546_v22  ;;  %v50_v37 = vld [vmem:[%s1096_s0 + $0xe8] sm:$0xff]  ;;  %v52_v41 = vld [vmem:[%s1096_s0 + $0xf8] sm:$0xff]  ;;  %v49_v43 = vld [vmem:[%s1096_s0 + $0xe0] sm:$0xff] }
   0xb   :  { %579 = vmatpush1.bf16.msra.mxu1 %v578_v26  ;;  %549 = vmatprep.subr.bf16.mxu0 %v548_v27  ;;  %v552_v40 = vpack.c.bf16 %v50_v37, %v46_v36  ;;  %v584_v44 = vpack.c.bf16 %v52_v41, %v48_v38  ;;  %v47_v45 = vld [vmem:[%s1096_s0 + $0xd0] sm:$0xff]  ;;  %v54_v47 = vld [vmem:[%s1096_s0 + $0x108] sm:$0xff]  ;;  %v56_v49 = vld [vmem:[%s1096_s0 + $0x118] sm:$0xff]  ;;  %v554_v51 = vpack.c.bf16 %v49_v43, %v45_v42 }
   0xc   :  { %581 = vmatprep.subr.bf16.mxu1 %v580_v31  ;;  %v51_v46 = vld [vmem:[%s1096_s0 + $0xf0] sm:$0xff]  ;;  %v58_v48 = vld [vmem:[%s1096_s0 + $0x128] sm:$0xff]  ;;  %v60_v50 = vld [vmem:[%s1096_s0 + $0x138] sm:$0xff] }
   0xd   :  { %v586_v52 = vpack.c.bf16 %v51_v46, %v47_v45  ;;  %v556_v53 = vpack.c.bf16 %v58_v48, %v54_v47  ;;  %v53_v54 = vld [vmem:[%s1096_s0 + $0x100] sm:$0xff]  ;;  %v55_v56 = vld [vmem:[%s1096_s0 + $0x110] sm:$0xff]  ;;  %v588_v57 = vpack.c.bf16 %v60_v50, %v56_v49  ;;  %v62_v59 = vld [vmem:[%s1096_s0 + $0x148] sm:$0xff] }
   0xe   :  { %551 = vmatpush1.bf16.msra.mxu0 %v550_v35  ;;  %v57_v55 = vld [vmem:[%s1096_s0 + $0x120] sm:$0xff]  ;;  %v59_v58 = vld [vmem:[%s1096_s0 + $0x130] sm:$0xff]  ;;  %v66_v60 = vld [vmem:[%s1096_s0 + $0x168] sm:$0xff] }
   0xf   :  { %583 = vmatpush1.bf16.msra.mxu1 %v582_v39  ;;  %553 = vmatprep.subr.bf16.mxu0 %v552_v40  ;;  %v64_v61 = vld [vmem:[%s1096_s0 + $0x158] sm:$0xff]  ;;  %v558_v63 = vpack.c.bf16 %v57_v55, %v53_v54  ;;  %v590_v0 = vpack.c.bf16 %v59_v58, %v55_v56  ;;  %v560_v1 = vpack.c.bf16 %v66_v60, %v62_v59  ;;  %v61_v2 = vld [vmem:[%s1096_s0 + $0x140] sm:$0xff]  ;;  %v63_v4 = vld [vmem:[%s1096_s0 + $0x150] sm:$0xff] }
  0x10   :  { %585 = vmatprep.subr.bf16.mxu1 %v584_v44  ;;  %v68_v62 = vld [vmem:[%s1096_s0 + $0x178] sm:$0xff]  ;;  %v65_v3 = vld [vmem:[%s1096_s0 + $0x160] sm:$0xff]  ;;  %v67_v6 = vld [vmem:[%s1096_s0 + $0x170] sm:$0xff] }
  0x11   :  { %v592_v5 = vpack.c.bf16 %v68_v62, %v64_v61  ;;  %v70_v7 = vld [vmem:[%s1096_s0 + $0x188] sm:$0xff]  ;;  %v72_v9 = vld [vmem:[%s1096_s0 + $0x198] sm:$0xff]  ;;  %v562_v11 = vpack.c.bf16 %v65_v3, %v61_v2  ;;  %v594_v12 = vpack.c.bf16 %v67_v6, %v63_v4  ;;  %v69_v14 = vld [vmem:[%s1096_s0 + $0x180] sm:$0xff] }
  0x12   :  { %555 = vmatpush1.bf16.msra.mxu0 %v554_v51  ;;  %v74_v8 = vld [vmem:[%s1096_s0 + $0x1a8] sm:$0xff]  ;;  %v76_v10 = vld [vmem:[%s1096_s0 + $0x1b8] sm:$0xff]  ;;  %v73_v15 = vld [vmem:[%s1096_s0 + $0x1a0] sm:$0xff] }
  0x13   :  { %587 = vmatpush1.bf16.msra.mxu1 %v586_v52  ;;  %557 = vmatprep.subr.bf16.mxu0 %v556_v53  ;;  %v564_v13 = vpack.c.bf16 %v74_v8, %v70_v7  ;;  %v71_v16 = vld [vmem:[%s1096_s0 + $0x190] sm:$0xff]  ;;  %v596_v17 = vpack.c.bf16 %v76_v10, %v72_v9  ;;  %v78_v19 = vld [vmem:[%s1096_s0 + $0x1c8] sm:$0xff]  ;;  %v80_v21 = vld [vmem:[%s1096_s0 + $0x1d8] sm:$0xff]  ;;  %v566_v23 = vpack.c.bf16 %v73_v15, %v69_v14 }
  0x14   :  { %589 = vmatprep.subr.bf16.mxu1 %v588_v57  ;;  %v75_v18 = vld [vmem:[%s1096_s0 + $0x1b0] sm:$0xff]  ;;  %v82_v20 = vld [vmem:[%s1096_s0 + $0x1e8] sm:$0xff]  ;;  %v84_v22 = vld [vmem:[%s1096_s0 + $0x1f8] sm:$0xff] }
  0x15   :  { %v598_v24 = vpack.c.bf16 %v75_v18, %v71_v16  ;;  %v568_v25 = vpack.c.bf16 %v82_v20, %v78_v19  ;;  %v77_v26 = vld [vmem:[%s1096_s0 + $0x1c0] sm:$0xff]  ;;  %v79_v28 = vld [vmem:[%s1096_s0 + $0x1d0] sm:$0xff]  ;;  %v600_v29 = vpack.c.bf16 %v84_v22, %v80_v21  ;;  %v270_v32 = vld [vmem:[%s1097_s1 + $0x88] sm:$0xff] }
  0x16   :  { %559 = vmatpush1.bf16.msra.mxu0 %v558_v63  ;;  %v81_v27 = vld [vmem:[%s1096_s0 + $0x1e0] sm:$0xff]  ;;  %v83_v30 = vld [vmem:[%s1096_s0 + $0x1f0] sm:$0xff]  ;;  %v302_v34 = vld [vmem:[%s1097_s1 + $0x188] sm:$0xff] }
  0x17   :  { %591 = vmatpush1.bf16.msra.mxu1 %v590_v0  ;;  %561 = vmatprep.subr.bf16.mxu0 %v560_v1  ;;  %v269_v31 = vld [vmem:[%s1097_s1 + $0x80] sm:$0xff]  ;;  %v570_v35 = vpack.c.bf16 %v81_v27, %v77_v26  ;;  %v602_v36 = vpack.c.bf16 %v83_v30, %v79_v28  ;;  %v254_v39 = vld [vmem:[%s1097_s1 + $0x8] sm:$0xff]  ;;  %v271_v43 = vld [vmem:[%s1097_s1 + $0x90] sm:$0xff] }
  0x18   :  { %593 = vmatprep.subr.bf16.mxu1 %v592_v5  ;;  %v301_v33 = vld [vmem:[%s1097_s1 + $0x180] sm:$0xff]  ;;  %v604_v37 = vpack.c.bf16 %v270_v32, %v269_v31  ;;  %v286_v42 = vld [vmem:[%s1097_s1 + $0x108] sm:$0xff]  ;;  %v272_v44 = vld [vmem:[%s1097_s1 + $0x98] sm:$0xff] }
  0x19   :  { %v253_v38 = vld [vmem:[%s1097_s1] sm:$0xff]  ;;  %v636_v41 = vpack.c.bf16 %v302_v34, %v301_v33  ;;  %v303_v45 = vld [vmem:[%s1097_s1 + $0x190] sm:$0xff]  ;;  %v304_v46 = vld [vmem:[%s1097_s1 + $0x198] sm:$0xff]  ;;  %v608_v50 = vpack.c.bf16 %v272_v44, %v271_v43 }
  0x1a   :  { %563 = vmatpush1.bf16.msra.mxu0 %v562_v11  ;;  %v285_v40 = vld [vmem:[%s1097_s1 + $0x100] sm:$0xff]  ;;  %v606_v48 = vpack.c.bf16 %v254_v39, %v253_v38  ;;  %v255_v51 = vld [vmem:[%s1097_s1 + $0x10] sm:$0xff]  ;;  %v256_v52 = vld [vmem:[%s1097_s1 + $0x18] sm:$0xff]  ;;  %v640_v54 = vpack.c.bf16 %v304_v46, %v303_v45 }
  0x1b   :  { %595 = vmatpush1.bf16.msra.mxu1 %v594_v12  ;;  %565 = vmatprep.subr.bf16.mxu0 %v564_v13  ;;  %v20_v47 = vld [vmem:[%s1098_s4] sm:$0xff]  ;;  %v638_v49 = vpack.c.bf16 %v286_v42, %v285_v40  ;;  %v287_v53 = vld [vmem:[%s1097_s1 + $0x110] sm:$0xff]  ;;  %v288_v55 = vld [vmem:[%s1097_s1 + $0x118] sm:$0xff]  ;;  %v610_v60 = vpack.c.bf16 %v256_v52, %v255_v51 }
  0x1c   :  { %597 = vmatprep.subr.bf16.mxu1 %v596_v17  ;;  %v273_v56 = vld [vmem:[%s1097_s1 + $0xa0] sm:$0xff]  ;;  %v274_v57 = vld [vmem:[%s1097_s1 + $0xa8] sm:$0xff]  ;;  %v642_v61 = vpack.c.bf16 %v288_v55, %v287_v53  ;;  %v275_v4 = vld [vmem:[%s1097_s1 + $0xb0] sm:$0xff] }
  0x1d   :  { %v305_v58 = vld [vmem:[%s1097_s1 + $0x1a0] sm:$0xff]  ;;  %v306_v59 = vld [vmem:[%s1097_s1 + $0x1a8] sm:$0xff]  ;;  %v612_v62 = vpack.c.bf16 %v274_v57, %v273_v56  ;;  %v276_v5 = vld [vmem:[%s1097_s1 + $0xb8] sm:$0xff] }
  0x1e   :  { %567 = vmatpush1.bf16.msra.mxu0 %v566_v23  ;;  %v257_v63 = vld [vmem:[%s1097_s1 + $0x20] sm:$0xff]  ;;  %v258_v0 = vld [vmem:[%s1097_s1 + $0x28] sm:$0xff]  ;;  %v644_v2 = vpack.c.bf16 %v306_v59, %v305_v58  ;;  %v307_v6 = vld [vmem:[%s1097_s1 + $0x1b0] sm:$0xff]  ;;  %v616_v10 = vpack.c.bf16 %v276_v5, %v275_v4 }
  0x1f   :  { %599 = vmatpush1.bf16.msra.mxu1 %v598_v24  ;;  %569 = vmatprep.subr.bf16.mxu0 %v568_v25  ;;  %v289_v1 = vld [vmem:[%s1097_s1 + $0x120] sm:$0xff]  ;;  %v290_v3 = vld [vmem:[%s1097_s1 + $0x128] sm:$0xff]  ;;  %v308_v7 = vld [vmem:[%s1097_s1 + $0x1b8] sm:$0xff]  ;;  %v614_v8 = vpack.c.bf16 %v258_v0, %v257_v63 }
  0x20   :  { %601 = vmatprep.subr.bf16.mxu1 %v600_v29  ;;  %v646_v9 = vpack.c.bf16 %v290_v3, %v289_v1  ;;  %v259_v11 = vld [vmem:[%s1097_s1 + $0x30] sm:$0xff]  ;;  %v260_v12 = vld [vmem:[%s1097_s1 + $0x38] sm:$0xff]  ;;  %v648_v14 = vpack.c.bf16 %v308_v7, %v307_v6  ;;  %v277_v16 = vld [vmem:[%s1097_s1 + $0xc0] sm:$0xff] }
  0x21   :  { %v291_v13 = vld [vmem:[%s1097_s1 + $0x130] sm:$0xff]  ;;  %v292_v15 = vld [vmem:[%s1097_s1 + $0x138] sm:$0xff]  ;;  %v278_v17 = vld [vmem:[%s1097_s1 + $0xc8] sm:$0xff]  ;;  %v618_v20 = vpack.c.bf16 %v260_v12, %v259_v11 }
  0x22   :  { %571 = vmatpush1.bf16.msra.mxu0 %v570_v35  ;;  %v309_v18 = vld [vmem:[%s1097_s1 + $0x1c0] sm:$0xff]  ;;  %v310_v19 = vld [vmem:[%s1097_s1 + $0x1c8] sm:$0xff]  ;;  %v650_v21 = vpack.c.bf16 %v292_v15, %v291_v13  ;;  %v620_v22 = vpack.c.bf16 %v278_v17, %v277_v16  ;;  %v279_v28 = vld [vmem:[%s1097_s1 + $0xd0] sm:$0xff] }
  0x23   :  { %603 = vmatpush1.bf16.msra.mxu1 %v602_v36  ;;  %605 = vmatprep.subr.bf16.mxu0 %v604_v37  ;;  %v261_v23 = vld [vmem:[%s1097_s1 + $0x40] sm:$0xff]  ;;  %v262_v24 = vld [vmem:[%s1097_s1 + $0x48] sm:$0xff]  ;;  %v652_v26 = vpack.c.bf16 %v310_v19, %v309_v18  ;;  %v280_v29 = vld [vmem:[%s1097_s1 + $0xd8] sm:$0xff] }
  0x24   :  { %637 = vmatprep.subr.bf16.mxu1 %v636_v41  ;;  %v293_v25 = vld [vmem:[%s1097_s1 + $0x140] sm:$0xff]  ;;  %v294_v27 = vld [vmem:[%s1097_s1 + $0x148] sm:$0xff]  ;;  %v311_v30 = vld [vmem:[%s1097_s1 + $0x1d0] sm:$0xff]  ;;  %v622_v32 = vpack.c.bf16 %v262_v24, %v261_v23  ;;  %v624_v34 = vpack.c.bf16 %v280_v29, %v279_v28 }
  0x25   :  { %172 = vmatmul.mubr.f32.vlgmr.msra.gmra.mrb[0].mxu0 %v20_v47  ;;  %v312_v31 = vld [vmem:[%s1097_s1 + $0x1d8] sm:$0xff]  ;;  %v654_v33 = vpack.c.bf16 %v294_v27, %v293_v25  ;;  %v263_v35 = vld [vmem:[%s1097_s1 + $0x50] sm:$0xff]  ;;  %v281_v40 = vld [vmem:[%s1097_s1 + $0xe0] sm:$0xff] }
  0x26   :  { %243 = vmatmul.mubr.f32.vlgmr.msra.gmra.mrb[0].mxu1 %v20_v47  ;;  %607 = vmatpush3.bf16.msra.mxu0 %v606_v48  ;;  %v264_v36 = vld [vmem:[%s1097_s1 + $0x58] sm:$0xff]  ;;  %v295_v37 = vld [vmem:[%s1097_s1 + $0x150] sm:$0xff]  ;;  %v656_v38 = vpack.c.bf16 %v312_v31, %v311_v30  ;;  %v282_v41 = vld [vmem:[%s1097_s1 + $0xe8] sm:$0xff] }
  0x27   :  { %639 = vmatpush3.bf16.msra.mxu1 %v638_v49  ;;  %609 = vmatprep.subr.bf16.mxu0 %v608_v50  ;;  %v296_v39 = vld [vmem:[%s1097_s1 + $0x158] sm:$0xff]  ;;  %v313_v42 = vld [vmem:[%s1097_s1 + $0x1e0] sm:$0xff]  ;;  %v314_v43 = vld [vmem:[%s1097_s1 + $0x1e8] sm:$0xff]  ;;  %v626_v44 = vpack.c.bf16 %v264_v36, %v263_v35  ;;  %v628_v46 = vpack.c.bf16 %v282_v41, %v281_v40 }
  0x28   :  { %641 = vmatprep.subr.bf16.mxu1 %v640_v54  ;;  %v658_v45 = vpack.c.bf16 %v296_v39, %v295_v37  ;;  %v660_v47 = vpack.c.bf16 %v314_v43, %v313_v42  ;;  %v265_v48 = vld [vmem:[%s1097_s1 + $0x60] sm:$0xff]  ;;  %v266_v49 = vld [vmem:[%s1097_s1 + $0x68] sm:$0xff]  ;;  %v283_v54 = vld [vmem:[%s1097_s1 + $0xf0] sm:$0xff] }
  0x29   :  { %v297_v50 = vld [vmem:[%s1097_s1 + $0x160] sm:$0xff]  ;;  %v630_v51 = vpack.c.bf16 %v266_v49, %v265_v48  ;;  %v298_v52 = vld [vmem:[%s1097_s1 + $0x168] sm:$0xff]  ;;  %v284_v55 = vld [vmem:[%s1097_s1 + $0xf8] sm:$0xff] }
  0x2a   :  { %611 = vmatpush3.bf16.msra.mxu0 %v610_v60  ;;  %v662_v53 = vpack.c.bf16 %v298_v52, %v297_v50  ;;  %v315_v56 = vld [vmem:[%s1097_s1 + $0x1f0] sm:$0xff]  ;;  %v632_v57 = vpack.c.bf16 %v284_v55, %v283_v54  ;;  %v316_v58 = vld [vmem:[%s1097_s1 + $0x1f8] sm:$0xff]  ;;  %v85_v5 = vld [vmem:[%s1099_s2] sm:$0xf] }
  0x2b   :  { %643 = vmatpush3.bf16.msra.mxu1 %v642_v61  ;;  %613 = vmatprep.subr.bf16.mxu0 %v612_v62  ;;  %v267_v59 = vld [vmem:[%s1097_s1 + $0x70] sm:$0xff]  ;;  %v268_v60 = vld [vmem:[%s1097_s1 + $0x78] sm:$0xff]  ;;  %v664_v61 = vpack.c.bf16 %v316_v58, %v315_v56  ;;  %v469_v27 = vld [vmem:[%s1100_s3] ss:$0 sm:$0xff] }
  0x2c   :  { %645 = vmatprep.subr.bf16.mxu1 %v644_v2  ;;  %v634_v62 = vpack.c.bf16 %v268_v60, %v267_v59  ;;  %v299_v63 = vld [vmem:[%s1097_s1 + $0x170] sm:$0xff]  ;;  %v300_v0 = vld [vmem:[%s1097_s1 + $0x178] sm:$0xff]  ;;  %v87_v2 = vlaneseq }
  0x2d   :  { %v666_v1 = vpack.c.bf16 %v300_v0, %v299_v63 }
  0x2e   :  { %615 = vmatpush3.bf16.msra.mxu0 %v614_v8  ;;  %v88_v3 = vshrl.u32 %v87_v2, 7 }
  0x2f   :  { %647 = vmatpush3.bf16.msra.mxu1 %v646_v9  ;;  %617 = vmatprep.subr.bf16.mxu0 %v616_v10 }
  0x30   :  { %649 = vmatprep.subr.bf16.mxu1 %v648_v14  ;;  %v89_v4 = vsub.s32 0, %v88_v3  ;;  %v97_v6 = vsub.s32 2, %v88_v3  ;;  %v93_v7 = vsub.s32 1, %v88_v3  ;;  %v101_v8 = vsub.s32 3, %v88_v3 }
  0x32   :  { %619 = vmatpush3.bf16.msra.mxu0 %v618_v20  ;;  %v90_v9 = vrot.slane %v85_v5, %v89_v4  ;;  %v98_v10 = vrot.slane %v85_v5, %v97_v6  ;;  %v94_v11 = vrot.slane %v85_v5, %v93_v7  ;;  %v102_v12 = vrot.slane %v85_v5, %v101_v8 }
  0x33   :  { %651 = vmatpush3.bf16.msra.mxu1 %v650_v21  ;;  %621 = vmatprep.subr.bf16.mxu0 %v620_v22 }
  0x34   :  { %653 = vmatprep.subr.bf16.mxu1 %v652_v26 }
  0x36   :  { %623 = vmatpush3.bf16.msra.mxu0 %v622_v32 }
  0x37   :  { %655 = vmatpush3.bf16.msra.mxu1 %v654_v33  ;;  %625 = vmatprep.subr.bf16.mxu0 %v624_v34 }
  0x38   :  { %657 = vmatprep.subr.bf16.mxu1 %v656_v38 }
  0x3a   :  { %627 = vmatpush3.bf16.msra.mxu0 %v626_v44 }
  0x3b   :  { %659 = vmatpush3.bf16.msra.mxu1 %v658_v45  ;;  %629 = vmatprep.subr.bf16.mxu0 %v628_v46 }
  0x3c   :  { %661 = vmatprep.subr.bf16.mxu1 %v660_v47 }
  0x3e   :  { %631 = vmatpush3.bf16.msra.mxu0 %v630_v51 }
  0x3f   :  { %663 = vmatpush3.bf16.msra.mxu1 %v662_v53  ;;  %633 = vmatprep.subr.bf16.mxu0 %v632_v57 }
  0x40   :  { %665 = vmatprep.subr.bf16.mxu1 %v664_v61 }
  0x42   :  { %635 = vmatpush3.bf16.msra.mxu0 %v634_v62 }
  0x43   :  { %667 = vmatpush3.bf16.msra.mxu1 %v666_v1 }
  0xf8   :  { %v173_v13 = vpop.f32.mrb[0].mxu0 }
  0xf9   :  { %v174_v14 = vadd.f32 %v173_v13, %v90_v9  ;;  %v244_v15 = vpop.f32.mrb[0].mxu1  ;;  %v175_v16 = vpop.f32.mrb[1].mxu0 }
  0xfa   :  { %v245_v17 = vadd.f32 %v244_v15, %v98_v10  ;;  %v176_v18 = vadd.f32 %v175_v16, %v94_v11  ;;  %v246_v19 = vpop.f32.mrb[1].mxu1 }
  0xfb   :  { %v247_v20 = vadd.f32 %v246_v19, %v102_v12  ;;  %v249_v23 = vmax.f32 %v174_v14, 0.0 }
  0xfc   :  { %v251_v21 = vmax.f32 %v245_v17, 0.0  ;;  %v250_v22 = vmax.f32 %v176_v18, 0.0 }
  0xfd   :  { %v252_v24 = vmax.f32 %v247_v20, 0.0 }
  0xfe   :  { %388 = vmatprep.mubr.f32.mxu0 %v250_v22 }
  0xff   :  { %458 = vmatprep.mubr.f32.mxu1 %v252_v24  ;;  %389 = vmatmul.mubr.f32.vlgmr.msra.gmra.mrb[2].mxu0 %v249_v23 }
 0x100   :  { %459 = vmatmul.mubr.f32.vlgmr.msra.gmra.mrb[2].mxu1 %v251_v21 }
 0x1d2   :  { %v502_v25 = vpop.f32.mrb[2].mxu0 }
 0x1d3   :  { %v537_v26 = vpop.f32.mrb[2].mxu1  ;;  %v503_v28 = vpop.f32.mrb[3].mxu0 }
 0x1d4   :  { %v504_v29 = vadd.f32 %v503_v28, %v502_v25  ;;  %v538_v30 = vpop.f32.mrb[3].mxu1 }
 0x1d5   :  { %v539_v31 = vadd.f32 %v538_v30, %v537_v26 }
 0x1d6   :  { %v391_v32 = vadd.f32 %v504_v29, %v469_v27 }
 0x1d8   :  { %v461_v33 = vadd.f32 %v539_v31, %v391_v32 }
 0x1da   :  { %464 = vst [vmem:[%s1101_s5] sm:$0xff] %v461_v33 }

</bundles_post_ra>
